<compile_context>
chip_gen: v7x
topology: tpu7x:2x2x1
jax: 0.10.0
libtpu: 0.0.40
codegen_flags: <defaults>
</compile_context>

<pallas_src>
import functools

import jax
import jax.numpy as jnp
from jax.experimental import pallas as pl
from jax.experimental.pallas import tpu as pltpu

EPS = 1e-8  # matches nn.LayerNorm(eps=1e-08)


def _residual_block_b_kernel(x_ref, w1_ref, w2_ref, p_ref, out_ref, pad_ref,
                             *, T, C, K, dil, mxu_dtype):
    """One grid step == Bb batch elements, whole sequence resident in VMEM."""
    Bb = x_ref.shape[0]
    dil2 = dil * 2
    pad1 = (K - 1) * dil
    pad2 = (K - 1) * dil2

    p = p_ref[...]                                   # (8, C) f32 packed params
    b1, g1, be1 = p[0:1, :], p[1:2, :], p[2:3, :]
    b2, g2, be2 = p[3:4, :], p[4:5, :], p[5:6, :]

    # Causal zero halo: pad2 rows at the top of the scratch.  Rewritten every step so the
    # kernel stays correct no matter how the "parallel" grid is split across TensorCores.
    if pad2 > 0:
        pad_ref[:, :pad2, :] = jnp.zeros((Bb, pad2, C), pad_ref.dtype)

    def conv_ln_relu(base, step, w_ref, bias, gamma, beta):
        # K dilated causal taps read as static slices of the padded scratch ref; each tap
        # feeds one (Bb*T, C) x (C, C) MXU matmul accumulated in f32.  No lane concats.
        def tap(j):
            off = base + j * step
            return pad_ref[:, off:off + T, :].astype(mxu_dtype).reshape(Bb * T, C)

        acc = jnp.dot(tap(0), w_ref[0], preferred_element_type=jnp.float32)
        for j in range(1, K):
            acc += jnp.dot(tap(j), w_ref[j], preferred_element_type=jnp.float32)
        acc += bias

        # Two-pass LayerNorm over channels (lane dim) + ReLU.
        mean = jnp.mean(acc, axis=-1, keepdims=True)
        cen = acc - mean
        var = jnp.mean(cen * cen, axis=-1, keepdims=True)
        y = cen * jax.lax.rsqrt(var + EPS) * gamma + beta
        return jnp.maximum(y, 0.0)                                    # (Bb*T, C) f32

    # ---- conv1: causal dilated conv (dilation = dil) ----
    pad_ref[:, pad2:, :] = x_ref[...].astype(pad_ref.dtype)           # stage x once
    h = conv_ln_relu(pad2 - pad1, dil, w1_ref, b1, g1, be1)

    # ---- conv2: causal dilated conv (dilation = 2 * dil), operands staged from h ----
    pad_ref[:, pad2:, :] = h.reshape(Bb, T, C)
    o = conv_ln_relu(0, dil2, w2_ref, b2, g2, be2)

    # ---- residual add (enable_res_parameter=False => plain `out2 + x`).  x is re-read
    # here instead of being held live across both convs.
    out_ref[...] = (o.reshape(Bb, T, C)
                    + x_ref[...].astype(jnp.float32)).astype(out_ref.dtype)


def _vmem_budget_bytes():
    """Generation-aware scoped-VMEM budget: ~75% on 128 MiB chips (v5e/v6e), ~60% on
    v7x's 64 MiB (headroom for compiler-internal scratch)."""
    try:
        phys = int(pltpu.get_tpu_info().vmem_capacity_bytes)
    except Exception:
        phys = 128 << 20
    frac = 0.60 if phys <= (64 << 20) else 0.75
    return int(phys * frac)


def _choose_batch_block(B, T, C, K, dil, x_itemsize, mxu_itemsize, vmem_budget):
    """Largest divisor of B whose per-step footprint fits ~1/3 of the VMEM budget, while
    keeping grid >= 2 so both v7x TensorCores get work.  Bigger Bb also fills the MXU
    M-dimension (Bb*T) and amortizes the ~0.35 us per-step pipeline overhead."""
    pad2 = (K - 1) * dil * 2
    const = 2 * (2 * K * C * C * mxu_itemsize) + 2 * 8 * C * 4   # weights + packed vectors
    per_b = (4 * T * C * x_itemsize                              # in + out blocks, double-buffered
             + (T + pad2) * C * 4                                # f32 tap scratch
             + 8 * T * C * 4)                                    # live f32 intermediates / headroom
    avail = max(vmem_budget // 3 - const, per_b)
    cap = max(1, avail // per_b)
    if B > 1:
        cap = min(cap, B // 2)   # grid >= 2: ("parallel",) can shard across v7x's 2 TCs
    cap = int(min(cap, B))
    return max(d for d in range(1, cap + 1) if B % d == 0)


def residual_block_b(x, params, *, kernel_size=3, dilation=2,
                     mxu_dtype=jnp.bfloat16, batch_block=None):
    """Forward pass of ResidualBlock_b (enable_res_parameter=False).

    params: w1/w2 as (K, C_in, C_out) with W_pallas[j, i, o] == W_torch[o, i, 0, j];
    b1/g1/be1/b2/g2/be2 are per-channel vectors of length C.
    mxu_dtype: dtype fed to the MXU (bf16 default on all generations; f32 accumulation
    and f32 intermediates either way)."""
    B, T, C = x.shape
    K = kernel_size
    pad2 = (K - 1) * dilation * 2

    vmem_budget = _vmem_budget_bytes()
    mxu_isz = jnp.dtype(mxu_dtype).itemsize
    Bb = (batch_block if batch_block is not None
          else _choose_batch_block(B, T, C, K, dilation,
                                   x.dtype.itemsize, mxu_isz, vmem_budget))
    assert B % Bb == 0, "batch block must divide batch"

    # Conv weights cast once so the weight DMA already carries the MXU feed dtype.
    w1 = params["w1"].astype(mxu_dtype)          # (K, C, C)
    w2 = params["w2"].astype(mxu_dtype)
    zc = jnp.zeros((C,), jnp.float32)
    pvec = jnp.stack([params["b1"], params["g1"], params["be1"],
                      params["b2"], params["g2"], params["be2"], zc, zc]
                     ).astype(jnp.float32)       # (8, C): one DMA instead of six

    kern = functools.partial(_residual_block_b_kernel, T=T, C=C, K=K,
                             dil=dilation, mxu_dtype=mxu_dtype)

    w_spec = pl.BlockSpec((K, C, C), lambda b: (0, 0, 0))

    return pl.pallas_call(
        kern,
        out_shape=jax.ShapeDtypeStruct((B, T, C), x.dtype),
        grid_spec=pltpu.PrefetchScalarGridSpec(
            num_scalar_prefetch=0,
            grid=(B // Bb,),
            in_specs=[
                pl.BlockSpec((Bb, T, C), lambda b: (b, 0, 0)),   # x: the only activation DMA
                w_spec, w_spec,                                  # conv1 / conv2 weights
                pl.BlockSpec((8, C), lambda b: (0, 0)),          # packed b1,g1,be1,b2,g2,be2
            ],
            out_specs=pl.BlockSpec((Bb, T, C), lambda b: (b, 0, 0)),
            scratch_shapes=[pltpu.VMEM((Bb, T + pad2, C), jnp.float32)],
        ),
        compiler_params=pltpu.CompilerParams(
            dimension_semantics=("parallel",),
            vmem_limit_bytes=vmem_budget),
    )(x, w1, w2, pvec)


def ref_forward(x, params, *, kernel_size=3, dilation=2):
    """Pure-JAX reference with identical semantics to the PyTorch module."""
    B, T, C = x.shape
    K = kernel_size

    def causal_conv(h, w, b, dil):
        pad = (K - 1) * dil
        hpad = jnp.pad(h, ((0, 0), (pad, 0), (0, 0)))
        out = b[None, None, :]
        for j in range(K):
            out = out + jnp.einsum("btc,co->bto", hpad[:, j * dil:j * dil + T, :], w[j])
        return out

    def ln(h, g, be):
        m = jnp.mean(h, axis=-1, keepdims=True)
        v = jnp.mean((h - m) ** 2, axis=-1, keepdims=True)
        return (h - m) / jnp.sqrt(v + EPS) * g + be

    h = jax.nn.relu(ln(causal_conv(x, params["w1"], params["b1"], dilation),
                       params["g1"], params["be1"]))
    h2 = jax.nn.relu(ln(causal_conv(h, params["w2"], params["b2"], dilation * 2),
                        params["g2"], params["be2"]))
    return h2 + x  # enable_res_parameter=False


if __name__ == "__main__":
    B, T, C = 2, 16, 32          # batch, sequence length, channels (in_channel == out_channel)
    K, DIL = 3, 2                # kernel_size, dilation

    key = jax.random.PRNGKey(0)
    keys = jax.random.split(key, 9)
    params = {
        "w1": 0.1 * jax.random.normal(keys[0], (K, C, C), jnp.float32),
        "b1": 0.1 * jax.random.normal(keys[1], (C,), jnp.float32),
        "g1": 1.0 + 0.1 * jax.random.normal(keys[2], (C,), jnp.float32),
        "be1": 0.1 * jax.random.normal(keys[3], (C,), jnp.float32),
        "w2": 0.1 * jax.random.normal(keys[4], (K, C, C), jnp.float32),
        "b2": 0.1 * jax.random.normal(keys[5], (C,), jnp.float32),
        "g2": 1.0 + 0.1 * jax.random.normal(keys[6], (C,), jnp.float32),
        "be2": 0.1 * jax.random.normal(keys[7], (C,), jnp.float32),
    }
    x = jax.random.normal(keys[8], (B, T, C), jnp.float32)

    ref = ref_forward(x, params, kernel_size=K, dilation=DIL)

    # Exact-dtype path (f32 fed to the MXU): tight tolerance.
    out_f32 = jax.block_until_ready(
        residual_block_b(x, params, kernel_size=K, dilation=DIL, mxu_dtype=jnp.float32))
    assert out_f32.shape == (B, T, C)
    max_err = float(jnp.max(jnp.abs(out_f32 - ref)))
    assert jnp.allclose(out_f32, ref, atol=1e-4, rtol=1e-4), f"f32 max_err={max_err}"

    # Default path: bf16 MXU operands, f32 accumulation & intermediates: looser tolerance.
    out_bf16 = jax.block_until_ready(
        residual_block_b(x, params, kernel_size=K, dilation=DIL))
    max_err_bf16 = float(jnp.max(jnp.abs(out_bf16 - ref)))
    assert max_err_bf16 < 0.15, f"bf16 max_err={max_err_bf16}"

    print("KERNEL_OK")
</pallas_src>

<mosaic_0001>
module attributes {stable_mosaic.version = 11 : i64} {
  func.func @_residual_block_b_kernel(%arg0: i32, %arg1: memref<1x16x32xf32, #tpu.memory_space<vmem>>, %arg2: memref<3x32x32xf32, #tpu.memory_space<vmem>>, %arg3: memref<3x32x32xf32, #tpu.memory_space<vmem>>, %arg4: memref<8x32xf32, #tpu.memory_space<vmem>>, %arg5: memref<1x16x32xf32, #tpu.memory_space<vmem>>, %arg6: memref<1x24x32xf32, #tpu.memory_space<vmem>>) attributes {dimension_semantics = [#tpu.dimension_semantics<parallel>], iteration_bounds = array<i64: 2>, scalar_prefetch = 0 : i64, scratch_operands = 1 : i64, tpu.core_type = #tpu.core_type<tc>, window_params = [{transform_indices = @transform_0, window_bounds = array<i64: 1, 16, 32>}, {pipeline_mode = #tpu.pipeline_mode<synchronous>, transform_indices = @transform_1, window_bounds = array<i64: 3, 32, 32>}, {pipeline_mode = #tpu.pipeline_mode<synchronous>, transform_indices = @transform_2, window_bounds = array<i64: 3, 32, 32>}, {pipeline_mode = #tpu.pipeline_mode<synchronous>, transform_indices = @transform_3, window_bounds = array<i64: 8, 32>}, {transform_indices = @transform_4, window_bounds = array<i64: 1, 16, 32>}]} {
    %c0 = arith.constant 0 : index
    %c0_0 = arith.constant 0 : index
    %0 = vector.load %arg4[%c0, %c0_0] : memref<8x32xf32, #tpu.memory_space<vmem>>, vector<8x32xf32>
    %1 = vector.extract_strided_slice %0 {offsets = [0, 0], sizes = [1, 32], strides = [1, 1]} : vector<8x32xf32> to vector<1x32xf32>
    %2 = vector.extract_strided_slice %0 {offsets = [1, 0], sizes = [1, 32], strides = [1, 1]} : vector<8x32xf32> to vector<1x32xf32>
    %3 = vector.extract_strided_slice %0 {offsets = [2, 0], sizes = [1, 32], strides = [1, 1]} : vector<8x32xf32> to vector<1x32xf32>
    %4 = vector.extract_strided_slice %0 {offsets = [3, 0], sizes = [1, 32], strides = [1, 1]} : vector<8x32xf32> to vector<1x32xf32>
    %5 = vector.extract_strided_slice %0 {offsets = [4, 0], sizes = [1, 32], strides = [1, 1]} : vector<8x32xf32> to vector<1x32xf32>
    %6 = vector.extract_strided_slice %0 {offsets = [5, 0], sizes = [1, 32], strides = [1, 1]} : vector<8x32xf32> to vector<1x32xf32>
    %cst = arith.constant 0.000000e+00 : f32
    %7 = vector.broadcast %cst : f32 to vector<1x8x32xf32>
    %c0_1 = arith.constant 0 : index
    %c0_2 = arith.constant 0 : index
    %c0_3 = arith.constant 0 : index
    %8 = vector.load %arg6[%c0_1, %c0_2, %c0_3] : memref<1x24x32xf32, #tpu.memory_space<vmem>>, vector<1x8x32xf32>
    tpu.vector_store %arg6[%c0_1, %c0_2, %c0_3], %7 {strides = array<i32>} : memref<1x24x32xf32, #tpu.memory_space<vmem>>, vector<1x8x32xf32>,
    %c0_4 = arith.constant 0 : index
    %c0_5 = arith.constant 0 : index
    %c0_6 = arith.constant 0 : index
    %9 = vector.load %arg1[%c0_4, %c0_5, %c0_6] : memref<1x16x32xf32, #tpu.memory_space<vmem>>, vector<1x16x32xf32>
    %c0_7 = arith.constant 0 : index
    %c8 = arith.constant 8 : index
    %c0_8 = arith.constant 0 : index
    %10 = vector.load %arg6[%c0_7, %c8, %c0_8] : memref<1x24x32xf32, #tpu.memory_space<vmem>>, vector<1x16x32xf32>
    tpu.vector_store %arg6[%c0_7, %c8, %c0_8], %9 {strides = array<i32>} : memref<1x24x32xf32, #tpu.memory_space<vmem>>, vector<1x16x32xf32>,
    %c0_9 = arith.constant 0 : index
    %c4 = arith.constant 4 : index
    %c0_10 = arith.constant 0 : index
    %11 = vector.load %arg6[%c0_9, %c4, %c0_10] : memref<1x24x32xf32, #tpu.memory_space<vmem>>, vector<1x16x32xf32>
    %12 = vector.shape_cast %11 : vector<1x16x32xf32> to vector<16x32xf32>
    %c0_11 = arith.constant 0 : index
    %c0_12 = arith.constant 0 : index
    %c0_13 = arith.constant 0 : index
    %13 = vector.load %arg2[%c0_11, %c0_12, %c0_13] : memref<3x32x32xf32, #tpu.memory_space<vmem>>, vector<1x32x32xf32>
    %14 = vector.shape_cast %13 : vector<1x32x32xf32> to vector<32x32xf32>
    %cst_14 = arith.constant dense<0.000000e+00> : vector<16x32xf32>
    %15 = tpu.matmul %12, %14, %cst_14 {dimension_numbers = #tpu.dot_dimension_numbers<[1], [0], [0], [1], [0, 0, 1, 1], [], []>} : vector<16x32xf32>, vector<32x32xf32>, vector<16x32xf32> -> vector<16x32xf32>
    %c0_15 = arith.constant 0 : index
    %c6 = arith.constant 6 : index
    %c0_16 = arith.constant 0 : index
    %16 = vector.load %arg6[%c0_15, %c6, %c0_16] : memref<1x24x32xf32, #tpu.memory_space<vmem>>, vector<1x16x32xf32>
    %17 = vector.shape_cast %16 : vector<1x16x32xf32> to vector<16x32xf32>
    %c1 = arith.constant 1 : index
    %c0_17 = arith.constant 0 : index
    %c0_18 = arith.constant 0 : index
    %18 = vector.load %arg2[%c1, %c0_17, %c0_18] : memref<3x32x32xf32, #tpu.memory_space<vmem>>, vector<1x32x32xf32>
    %19 = vector.shape_cast %18 : vector<1x32x32xf32> to vector<32x32xf32>
    %cst_19 = arith.constant dense<0.000000e+00> : vector<16x32xf32>
    %20 = tpu.matmul %17, %19, %cst_19 {dimension_numbers = #tpu.dot_dimension_numbers<[1], [0], [0], [1], [0, 0, 1, 1], [], []>} : vector<16x32xf32>, vector<32x32xf32>, vector<16x32xf32> -> vector<16x32xf32>
    %21 = arith.addf %15, %20 : vector<16x32xf32>
    %c0_20 = arith.constant 0 : index
    %c8_21 = arith.constant 8 : index
    %c0_22 = arith.constant 0 : index
    %22 = vector.load %arg6[%c0_20, %c8_21, %c0_22] : memref<1x24x32xf32, #tpu.memory_space<vmem>>, vector<1x16x32xf32>
    %23 = vector.shape_cast %22 : vector<1x16x32xf32> to vector<16x32xf32>
    %c2 = arith.constant 2 : index
    %c0_23 = arith.constant 0 : index
    %c0_24 = arith.constant 0 : index
    %24 = vector.load %arg2[%c2, %c0_23, %c0_24] : memref<3x32x32xf32, #tpu.memory_space<vmem>>, vector<1x32x32xf32>
    %25 = vector.shape_cast %24 : vector<1x32x32xf32> to vector<32x32xf32>
    %cst_25 = arith.constant dense<0.000000e+00> : vector<16x32xf32>
    %26 = tpu.matmul %23, %25, %cst_25 {dimension_numbers = #tpu.dot_dimension_numbers<[1], [0], [0], [1], [0, 0, 1, 1], [], []>} : vector<16x32xf32>, vector<32x32xf32>, vector<16x32xf32> -> vector<16x32xf32>
    %27 = arith.addf %21, %26 : vector<16x32xf32>
    %28 = vector.broadcast %1 : vector<1x32xf32> to vector<16x32xf32>
    %29 = arith.addf %27, %28 : vector<16x32xf32>
    %cst_26 = arith.constant dense<0.000000e+00> : vector<16xf32>
    %30 = vector.multi_reduction <add>, %29, %cst_26 [1] : vector<16x32xf32> to vector<16xf32>
    %31 = vector.shape_cast %30 : vector<16xf32> to vector<16x1xf32>
    %cst_27 = arith.constant 3.200000e+01 : f32
    %32 = vector.broadcast %cst_27 : f32 to vector<16x1xf32>
    %33 = arith.divf %31, %32 : vector<16x1xf32>
    %34 = vector.broadcast %33 : vector<16x1xf32> to vector<16x32xf32>
    %35 = arith.subf %29, %34 : vector<16x32xf32>
    %36 = arith.mulf %35, %35 : vector<16x32xf32>
    %cst_28 = arith.constant dense<0.000000e+00> : vector<16xf32>
    %37 = vector.multi_reduction <add>, %36, %cst_28 [1] : vector<16x32xf32> to vector<16xf32>
    %38 = vector.shape_cast %37 : vector<16xf32> to vector<16x1xf32>
    %cst_29 = arith.constant 3.200000e+01 : f32
    %39 = vector.broadcast %cst_29 : f32 to vector<16x1xf32>
    %40 = arith.divf %38, %39 : vector<16x1xf32>
    %cst_30 = arith.constant 9.99999993E-9 : f32
    %41 = vector.broadcast %cst_30 : f32 to vector<16x1xf32>
    %42 = arith.addf %40, %41 : vector<16x1xf32>
    %43 = math.rsqrt %42 : vector<16x1xf32>
    %44 = vector.broadcast %43 : vector<16x1xf32> to vector<16x32xf32>
    %45 = arith.mulf %35, %44 : vector<16x32xf32>
    %46 = vector.broadcast %2 : vector<1x32xf32> to vector<16x32xf32>
    %47 = arith.mulf %45, %46 : vector<16x32xf32>
    %48 = vector.broadcast %3 : vector<1x32xf32> to vector<16x32xf32>
    %49 = arith.addf %47, %48 : vector<16x32xf32>
    %cst_31 = arith.constant 0.000000e+00 : f32
    %50 = vector.broadcast %cst_31 : f32 to vector<16x32xf32>
    %51 = arith.maximumf %49, %50 : vector<16x32xf32>
    %52 = vector.shape_cast %51 : vector<16x32xf32> to vector<1x16x32xf32>
    %c0_32 = arith.constant 0 : index
    %c8_33 = arith.constant 8 : index
    %c0_34 = arith.constant 0 : index
    %53 = vector.load %arg6[%c0_32, %c8_33, %c0_34] : memref<1x24x32xf32, #tpu.memory_space<vmem>>, vector<1x16x32xf32>
    tpu.vector_store %arg6[%c0_32, %c8_33, %c0_34], %52 {strides = array<i32>} : memref<1x24x32xf32, #tpu.memory_space<vmem>>, vector<1x16x32xf32>,
    %c0_35 = arith.constant 0 : index
    %c0_36 = arith.constant 0 : index
    %c0_37 = arith.constant 0 : index
    %54 = vector.load %arg6[%c0_35, %c0_36, %c0_37] : memref<1x24x32xf32, #tpu.memory_space<vmem>>, vector<1x16x32xf32>
    %55 = vector.shape_cast %54 : vector<1x16x32xf32> to vector<16x32xf32>
    %c0_38 = arith.constant 0 : index
    %c0_39 = arith.constant 0 : index
    %c0_40 = arith.constant 0 : index
    %56 = vector.load %arg3[%c0_38, %c0_39, %c0_40] : memref<3x32x32xf32, #tpu.memory_space<vmem>>, vector<1x32x32xf32>
    %57 = vector.shape_cast %56 : vector<1x32x32xf32> to vector<32x32xf32>
    %cst_41 = arith.constant dense<0.000000e+00> : vector<16x32xf32>
    %58 = tpu.matmul %55, %57, %cst_41 {dimension_numbers = #tpu.dot_dimension_numbers<[1], [0], [0], [1], [0, 0, 1, 1], [], []>} : vector<16x32xf32>, vector<32x32xf32>, vector<16x32xf32> -> vector<16x32xf32>
    %c0_42 = arith.constant 0 : index
    %c4_43 = arith.constant 4 : index
    %c0_44 = arith.constant 0 : index
    %59 = vector.load %arg6[%c0_42, %c4_43, %c0_44] : memref<1x24x32xf32, #tpu.memory_space<vmem>>, vector<1x16x32xf32>
    %60 = vector.shape_cast %59 : vector<1x16x32xf32> to vector<16x32xf32>
    %c1_45 = arith.constant 1 : index
    %c0_46 = arith.constant 0 : index
    %c0_47 = arith.constant 0 : index
    %61 = vector.load %arg3[%c1_45, %c0_46, %c0_47] : memref<3x32x32xf32, #tpu.memory_space<vmem>>, vector<1x32x32xf32>
    %62 = vector.shape_cast %61 : vector<1x32x32xf32> to vector<32x32xf32>
    %cst_48 = arith.constant dense<0.000000e+00> : vector<16x32xf32>
    %63 = tpu.matmul %60, %62, %cst_48 {dimension_numbers = #tpu.dot_dimension_numbers<[1], [0], [0], [1], [0, 0, 1, 1], [], []>} : vector<16x32xf32>, vector<32x32xf32>, vector<16x32xf32> -> vector<16x32xf32>
    %64 = arith.addf %58, %63 : vector<16x32xf32>
    %c0_49 = arith.constant 0 : index
    %c8_50 = arith.constant 8 : index
    %c0_51 = arith.constant 0 : index
    %65 = vector.load %arg6[%c0_49, %c8_50, %c0_51] : memref<1x24x32xf32, #tpu.memory_space<vmem>>, vector<1x16x32xf32>
    %66 = vector.shape_cast %65 : vector<1x16x32xf32> to vector<16x32xf32>
    %c2_52 = arith.constant 2 : index
    %c0_53 = arith.constant 0 : index
    %c0_54 = arith.constant 0 : index
    %67 = vector.load %arg3[%c2_52, %c0_53, %c0_54] : memref<3x32x32xf32, #tpu.memory_space<vmem>>, vector<1x32x32xf32>
    %68 = vector.shape_cast %67 : vector<1x32x32xf32> to vector<32x32xf32>
    %cst_55 = arith.constant dense<0.000000e+00> : vector<16x32xf32>
    %69 = tpu.matmul %66, %68, %cst_55 {dimension_numbers = #tpu.dot_dimension_numbers<[1], [0], [0], [1], [0, 0, 1, 1], [], []>} : vector<16x32xf32>, vector<32x32xf32>, vector<16x32xf32> -> vector<16x32xf32>
    %70 = arith.addf %64, %69 : vector<16x32xf32>
    %71 = vector.broadcast %4 : vector<1x32xf32> to vector<16x32xf32>
    %72 = arith.addf %70, %71 : vector<16x32xf32>
    %cst_56 = arith.constant dense<0.000000e+00> : vector<16xf32>
    %73 = vector.multi_reduction <add>, %72, %cst_56 [1] : vector<16x32xf32> to vector<16xf32>
    %74 = vector.shape_cast %73 : vector<16xf32> to vector<16x1xf32>
    %cst_57 = arith.constant 3.200000e+01 : f32
    %75 = vector.broadcast %cst_57 : f32 to vector<16x1xf32>
    %76 = arith.divf %74, %75 : vector<16x1xf32>
    %77 = vector.broadcast %76 : vector<16x1xf32> to vector<16x32xf32>
    %78 = arith.subf %72, %77 : vector<16x32xf32>
    %79 = arith.mulf %78, %78 : vector<16x32xf32>
    %cst_58 = arith.constant dense<0.000000e+00> : vector<16xf32>
    %80 = vector.multi_reduction <add>, %79, %cst_58 [1] : vector<16x32xf32> to vector<16xf32>
    %81 = vector.shape_cast %80 : vector<16xf32> to vector<16x1xf32>
    %cst_59 = arith.constant 3.200000e+01 : f32
    %82 = vector.broadcast %cst_59 : f32 to vector<16x1xf32>
    %83 = arith.divf %81, %82 : vector<16x1xf32>
    %cst_60 = arith.constant 9.99999993E-9 : f32
    %84 = vector.broadcast %cst_60 : f32 to vector<16x1xf32>
    %85 = arith.addf %83, %84 : vector<16x1xf32>
    %86 = math.rsqrt %85 : vector<16x1xf32>
    %87 = vector.broadcast %86 : vector<16x1xf32> to vector<16x32xf32>
    %88 = arith.mulf %78, %87 : vector<16x32xf32>
    %89 = vector.broadcast %5 : vector<1x32xf32> to vector<16x32xf32>
    %90 = arith.mulf %88, %89 : vector<16x32xf32>
    %91 = vector.broadcast %6 : vector<1x32xf32> to vector<16x32xf32>
    %92 = arith.addf %90, %91 : vector<16x32xf32>
    %cst_61 = arith.constant 0.000000e+00 : f32
    %93 = vector.broadcast %cst_61 : f32 to vector<16x32xf32>
    %94 = arith.maximumf %92, %93 : vector<16x32xf32>
    %95 = vector.shape_cast %94 : vector<16x32xf32> to vector<1x16x32xf32>
    %c0_62 = arith.constant 0 : index
    %c0_63 = arith.constant 0 : index
    %c0_64 = arith.constant 0 : index
    %96 = vector.load %arg1[%c0_62, %c0_63, %c0_64] : memref<1x16x32xf32, #tpu.memory_space<vmem>>, vector<1x16x32xf32>
    %97 = arith.addf %95, %96 : vector<1x16x32xf32>
    %c0_65 = arith.constant 0 : index
    %c0_66 = arith.constant 0 : index
    %c0_67 = arith.constant 0 : index
    %98 = vector.load %arg5[%c0_65, %c0_66, %c0_67] : memref<1x16x32xf32, #tpu.memory_space<vmem>>, vector<1x16x32xf32>
    tpu.vector_store %arg5[%c0_65, %c0_66, %c0_67], %97 {strides = array<i32>} : memref<1x16x32xf32, #tpu.memory_space<vmem>>, vector<1x16x32xf32>,
    return
  }
  func.func @transform_0(%arg0: i32) -> (i32, i32, i32) {
    %c0_i32 = arith.constant 0 : i32
    %c0_i32_0 = arith.constant 0 : i32
    %c0_i32_1 = arith.constant 0 : i32
    return %arg0, %c0_i32, %c0_i32_0 : i32, i32, i32
  }
  func.func @transform_1(%arg0: i32) -> (i32, i32, i32) {
    %c0_i32 = arith.constant 0 : i32
    %c0_i32_0 = arith.constant 0 : i32
    %c0_i32_1 = arith.constant 0 : i32
    %c0_i32_2 = arith.constant 0 : i32
    return %c0_i32, %c0_i32_0, %c0_i32_1 : i32, i32, i32
  }
  func.func @transform_2(%arg0: i32) -> (i32, i32, i32) {
    %c0_i32 = arith.constant 0 : i32
    %c0_i32_0 = arith.constant 0 : i32
    %c0_i32_1 = arith.constant 0 : i32
    %c0_i32_2 = arith.constant 0 : i32
    return %c0_i32, %c0_i32_0, %c0_i32_1 : i32, i32, i32
  }
  func.func @transform_3(%arg0: i32) -> (i32, i32) {
    %c0_i32 = arith.constant 0 : i32
    %c0_i32_0 = arith.constant 0 : i32
    %c0_i32_1 = arith.constant 0 : i32
    return %c0_i32, %c0_i32_0 : i32, i32
  }
  func.func @transform_4(%arg0: i32) -> (i32, i32, i32) {
    %c0_i32 = arith.constant 0 : i32
    %c0_i32_0 = arith.constant 0 : i32
    %c0_i32_1 = arith.constant 0 : i32
    return %arg0, %c0_i32, %c0_i32_0 : i32, i32, i32
  }
}

</mosaic_0001>

<bundles_post_ra>
// kernel: tpu_custom_call.1
= control target key start
LH: loop header
LB: loop body
LE: loop exit
PB: predicated region body
PF: predicated region fallthrough
CT: control target
= control target key end

     0   :  { %9 = vsyncpa [#allocation4], 0  ;;  %s1842_s0 = inlined_call_operand.hbm [shape: f32[2,16,32], index: 0, kind: input, shape index: {}]   ;;  %s1843_s1 = inlined_call_operand.hbm [shape: f32[3,32,32], index: 1, kind: input, shape index: {}]   ;;  %s1844_s2 = inlined_call_operand.hbm [shape: f32[3,32,32], index: 2, kind: input, shape index: {}]   ;;  %s1845_s3 = inlined_call_operand.hbm [shape: f32[8,32], index: 3, kind: input, shape index: {}]   ;;  %s1846_s4 = inlined_call_operand.hbm [shape: f32[2,16,32], index: 4, kind: output, shape index: {}]  }
   0x1   :  { %11 = vsyncpa [#allocation4 + $0x1], 0 }
   0x2   :  { %12 = vsyncpa [#allocation7], 0 }
   0x3   :  { %13 = vsyncpa [#allocation10], 0 }
   0x4   :  { %14 = vsyncpa [#allocation5], 0 }
   0x5   :  { %16 = vsyncpa [#allocation5 + $0x1], 0  ;;  %s1519_s15 = smov 0   ;;  %s1521_s16 = smov 0  }
   0x6   :  { %s1523_s17 = smov 0   ;;  %s1525_s18 = smov 0  }
   0x7 LB: > { %s1540_s19 = sadd.s32 4294967295, %s1482_s18   ;;  %s1012_s20 = sadd.s32 4294967294, %s1482_s18   ;;  %s1482_s18 = sphi %s1525_s18, %s1869_s18   ;;  %s1478_s17 = sphi %s1523_s17, %s1868_s17   ;;  %s1474_s16 = sphi %s1521_s16, %s1867_s16   ;;  %s1470_s15 = sphi %s1519_s15, %s1866_s15  }
   0x8   : > { %p42_p0 = scmp.ne.s32.totalorder %s1474_s16, %s1470_s15  ;;  %p1847_p1 = scmp.eq.s32.totalorder %s1540_s19, 0 }
   0x9   : > { %p135_p3 = scmp.eq.s32.totalorder %s1012_s20, 1  ;;  %p1013_p5 = scmp.ge.s32.totalorder %s1482_s18, 1 }
   0xa   : > { %p1549_p4 = por %p1847_p1, %p42_p0  ;;  %p142_p7 = scmp.lt.s32.totalorder %s1482_s18, 3 }
   0xb   : > { %p1554_p6 = por %p135_p3, %p42_p0  ;;  %s1484_s24 = smov [#allocation6]  }
   0xc   : > { %s1850_s21 = scalar_select %p1549_p4, 1, 0 }
   0xd   : > { %s1851_s22 = scalar_select %p1554_p6, 1, 0 }
   0xe   : > { %p1559_p8 = pnand %p1013_p5, %p142_p7  ;;  %s154_s25 = sshll.u32 %s1484_s24, 4  ;;  %s1563_s25 = int_to_ptr.vmem [resolvable:$true] %s154_s25 }
   0xf   : > { %s1485_s27 = smov [#allocation8]   ;;  %s1486_s29 = smov [#allocation9]  }
  0x10   : > { %s1852_s23 = scalar_select %p1559_p8, 1, 0 }
  0x11   : > { %p1220_p9 = pneg %p1559_p8  ;;  %s167_s28 = sshll.u32 %s1485_s27, 4  ;;  %s1574_s28 = int_to_ptr.vmem [resolvable:$true] %s167_s28 }
  0x12   : > { %s1576_s30 = sshll.u32 %s1486_s29, 4  ;;  %s1294_s7 = scalar_lea.hbm %s1843_s1, 1536  ;;  %s182_s30 = int_to_ptr.vmem [resolvable:$true] %s1576_s30 }
  0x13   : > { %p1570_p11 = pnand %p1220_p9, %p1847_p1  ;;  %p1295_p12 = scmp.ne.s32.totalorder %s1843_s1, %s1294_s7 }
  0x14   : > { %p1301_p5 = scmp.lt.u32.totalorder %s1294_s7, %s1843_s1 }
  0x15   : > { %p1586_p13 = pneg %p1570_p11 }
  0x17   : > { %p1297_p0 = pnand %p1586_p13, %p1295_p12 }
  0x19   : > { %p1298_p3 = pneg %p1297_p0 }
  0x1b   : > { %p1303_p7 = pnand %p1301_p5, %p1298_p3 }
  0x1d   : > { %1306 = shalt.err (!%p1303_p7)
}
  0x1e   : > { %s1307_s13 = scalar_lea.vmem %s1563_s25, 1536  ;;  %p1315_p2 = scmp.lt.s32.totalorder %s1563_s25, %s1563_s25 }
  0x1f   : > { %p1308_p9 = scmp.ne.s32.totalorder %s1563_s25, %s1307_s13  ;;  %p1316_p6 = scmp.lt.s32.totalorder %s1307_s13, %s1307_s13 }
  0x21   : > { %p1310_p10 = pnand %p1308_p9, %p1586_p13  ;;  %p1317_p12 = por %p1316_p6, %p1315_p2 }
  0x23   : > { %p1311_p1 = pneg %p1310_p10 }
  0x25   : > { %p1318_p0 = pnand %p1317_p12, %p1311_p1 }
  0x27   : > { %1321 = shalt.err (!%p1318_p0)
}
  0x28   : > { %s1487_s14 = smov 128   ;;  %s1488_s20 = smov 8  }
  0x29   : > { %1223 = dma.hbm_to_vmem [thread:$0]  (!%p1570_p11), %s1843_s1, 1536, %s1563_s25, [#allocation7], %s1487_s14, %s1487_s14, %s1488_s20  }
  0x2a   : > { %s1322_s6 = scalar_lea.hbm %s1844_s2, 1536 }
  0x2b   : > { %p1323_p1 = scmp.ne.s32.totalorder %s1844_s2, %s1322_s6  ;;  %p1329_p10 = scmp.lt.u32.totalorder %s1322_s6, %s1844_s2 }
  0x2d   : > { %p1325_p2 = pnand %p1323_p1, %p1586_p13 }
  0x2f   : > { %p1326_p6 = pneg %p1325_p2 }
  0x31   : > { %p1331_p3 = pnand %p1329_p10, %p1326_p6 }
  0x33   : > { %1334 = shalt.err (!%p1331_p3)
}
  0x34   : > { %s1335_s25 = scalar_lea.vmem %s1574_s28, 1536  ;;  %p1343_p12 = scmp.lt.s32.totalorder %s1574_s28, %s1574_s28 }
  0x35   : > { %p1336_p5 = scmp.ne.s32.totalorder %s1574_s28, %s1335_s25  ;;  %p1344_p0 = scmp.lt.s32.totalorder %s1335_s25, %s1335_s25 }
  0x37   : > { %p1338_p7 = pnand %p1336_p5, %p1586_p13  ;;  %p1345_p1 = por %p1344_p0, %p1343_p12 }
  0x39   : > { %p1339_p9 = pneg %p1338_p7 }
  0x3b   : > { %p1346_p2 = pnand %p1345_p1, %p1339_p9 }
  0x3d   : > { %1349 = shalt.err (!%p1346_p2)
}
  0x3e   : > { %1226 = dma.hbm_to_vmem [thread:$0]  (!%p1570_p11), %s1844_s2, 1536, %s1574_s28, [#allocation7], %s1487_s14, %s1487_s14, %s1488_s20  }
  0x3f   : > { %s1350_s29 = scalar_lea.hbm %s1845_s3, 128 }
  0x40   : > { %p1351_p6 = scmp.ne.s32.totalorder %s1845_s3, %s1350_s29  ;;  %p1357_p5 = scmp.lt.u32.totalorder %s1350_s29, %s1845_s3 }
  0x42   : > { %p1353_p10 = pnand %p1351_p6, %p1586_p13 }
  0x44   : > { %p1354_p3 = pneg %p1353_p10 }
  0x46   : > { %p1359_p7 = pnand %p1357_p5, %p1354_p3 }
  0x48   : > { %1362 = shalt.err (!%p1359_p7)
}
  0x49   : > { %s1363_s9 = scalar_lea.vmem %s182_s30, 128  ;;  %p1371_p1 = scmp.lt.s32.totalorder %s182_s30, %s182_s30 }
  0x4a   : > { %p1364_p9 = scmp.ne.s32.totalorder %s182_s30, %s1363_s9  ;;  %p1372_p2 = scmp.lt.s32.totalorder %s1363_s9, %s1363_s9 }
  0x4c   : > { %p1366_p12 = pnand %p1364_p9, %p1586_p13  ;;  %p1373_p4 = por %p1372_p2, %p1371_p1 }
  0x4e   : > { %p1367_p0 = pneg %p1366_p12 }
  0x50   : > { %p1374_p8 = pnand %p1373_p4, %p1367_p0 }
  0x52   : > { %1377 = shalt.err (!%p1374_p8)
}
  0x53   : > { %1229 = dma.hbm_to_vmem [thread:$0]  (!%p1570_p11), %s1845_s3, 128, %s182_s30, [#allocation10]  }
  0x54   : > { %s1656_s10 = sadd.s32 1, %s1482_s18   ;;  %s29_s26 = sadd.s32 1, %s1478_s17 }
  0x55   : > { %s26_s25 = ssub.s32 %s1482_s18, %s1656_s10  ;;  %p36_p8 = scmp.ne.s32.totalorder %s1478_s17, %s1474_s16 }
  0x56   : > { %p27_p4 = scmp.eq.s32.totalorder %s26_s25, 0  ;;  %p37_p13 = scmp.eq.s32.totalorder %s1482_s18, 0 }
  0x57   : > { %p1241_p6 = scmp.lt.s32.totalorder %s1482_s18, 2  ;;  %p1855_p3 = scmp.eq.s32.totalorder %s1540_s19, 1 }
  0x58   : > { %s1666_s12 = scalar_select %p27_p4, %s1478_s17, %s29_s26  }
  0x59   : > { %p38_p10 = por %p37_p13, %p36_p8  ;;  %p1670_p5 = por %p1855_p3, %p36_p8 }
  0x5a   : > { %s192_s24 = sand.u32 1, %s1478_s17   ;;  %s1044_s27 = sshll.u32 %s1482_s18, 8 }
  0x5b   : > { %s1018_s30 = sshll.u32 %s192_s24, 4  ;;  %s1679_s6 = scalar_lea.hbm %s1842_s0, %s1044_s27 }
  0x5c   : > { %s196_s7 = scalar_lea.vmem [#allocation3], %s1018_s30  ;;  %p1681_p11 = pnand %p1241_p6, %p38_p10 }
  0x5d   : > { %s203_s8 = sshll.u32 %s196_s7, 4  ;;  %s1687_s28 = scalar_lea.sflag [#allocation4], %s192_s24  ;;  %s1685_s8 = int_to_ptr.vmem [resolvable:$true] %s203_s8 }
  0x5e   : > { %s1378_s11 = scalar_lea.hbm %s1679_s6, 256  ;;  %p1380_p9 = pneg %p1681_p11 }
  0x5f   : > { %p1379_p7 = scmp.ne.s32.totalorder %s1679_s6, %s1378_s11  ;;  %s1383_s27 = scalar_lea.hbm %s1842_s0, 512 }
  0x60   : > { %p1384_p1 = scmp.lt.u32.totalorder %s1679_s6, %s1842_s0  ;;  %p1385_p2 = scmp.lt.u32.totalorder %s1383_s27, %s1378_s11 }
  0x61   : > { %p1381_p12 = pnand %p1380_p9, %p1379_p7  ;;  %p1387_p8 = scmp.lt.u32.totalorder %s1378_s11, %s1679_s6 }
  0x62   : > { %p1386_p4 = por %p1385_p2, %p1384_p1 }
  0x63   : > { %p1382_p0 = pneg %p1381_p12 }
  0x64   : > { %p1388_p13 = por %p1387_p8, %p1386_p4 }
  0x66   : > { %p1389_p6 = pnand %p1388_p13, %p1382_p0 }
  0x68   : > { %1392 = shalt.err (!%p1389_p6)
}
  0x69   : > { %s1393_s24 = scalar_lea.vmem %s1685_s8, 256  ;;  %s1489_s5 = smov [#allocation3]  }
  0x6a   : > { %p1394_p10 = scmp.ne.s32.totalorder %s1685_s8, %s1393_s24  ;;  %s1398_s7 = sshll.u32 %s1489_s5, 4  ;;  %s1399_s7 = int_to_ptr.vmem [resolvable:$false] %s1398_s7 }
  0x6b   : > { %s1400_s25 = scalar_lea.vmem %s1399_s7, 512  ;;  %p1401_p12 = scmp.lt.s32.totalorder %s1685_s8, %s1399_s7 }
  0x6c   : > { %p1396_p3 = pnand %p1394_p10, %p1380_p9  ;;  %p1402_p1 = scmp.lt.s32.totalorder %s1400_s25, %s1393_s24 }
  0x6e   : > { %p1397_p7 = pneg %p1396_p3  ;;  %p1403_p2 = por %p1402_p1, %p1401_p12 }
  0x70   : > { %p1404_p4 = pnand %p1403_p2, %p1397_p7 }
  0x72   : > { %1407 = shalt.err (!%p1404_p4)
}
  0x73   : > { %1233 = dma.hbm_to_vmem [thread:$0]  (!%p1681_p11), %s1679_s6, 256, %s1685_s8, %s1687_s28, %s1487_s14, %s1487_s14, %s1488_s20  }
  0x74   : > { %p1858_p9 = scmp.ne.s32.totalorder %s1852_s23, 0 }
  0x75   : > { %s1721_s11 = sand.u32 (!%p1858_p9), 1, %s1474_s16   ;;  %p1859_p0 = scmp.ne.s32.totalorder (!%p1858_p9), %s1850_s21, 0 }
  0x76   : > { %215 = sbr.rel (%p1858_p9) target bundleno = 1266 (0x4f2), region = 36  ;;  %s1022_s26 = sshll.u32 (!%p1858_p9), %s1721_s11, 4 }
  0x77   : > { %s218_s27 = scalar_lea.sflag (!%p1858_p9), [#allocation4], %s1721_s11  ;;  %s221_s9 = scalar_lea.vmem (!%p1858_p9), [#allocation3], %s1022_s26 }
  0x7d   : > { %1453 = dma.done.wait (%p1859_p0), %s218_s27, 256  }
  0x7e   : > { %1455 = vsyncadd (%p1859_p0), %s218_s27, 4294967040  ;;  %p1860_p11 = scmp.eq.s32.totalorder %s1540_s19, 0 }
  0x80   : > { %1457 = dma.done.wait (%p1860_p11), [#allocation7], 3072   ;;  %p1861_p8 = pmov %p1860_p11 }
  0x82   : > { %1459 = vsyncadd (%p1861_p8), [#allocation7], 4294964224  ;;  %p1862_p13 = pmov %p1861_p8 }
  0x83   : > { %p1863_p6 = pmov %p1861_p8 }
  0x84   : > { %1461 = dma.done.wait (%p1862_p13), [#allocation10], 128  }
  0x85   : > { %1463 = vsyncadd (%p1863_p6), [#allocation10], 4294967168  ;;  %vm259_vm0 = vcmask 261120   ;;  %v1490_v0 = vmov 0.0   ;;  %v274_v1 = vld [vmem:[#allocation6 + $0x20] sm:$0xff]  ;;  %v275_v2 = vld [vmem:[#allocation6 + $0x28] sm:$0xff]  ;;  %v530_v27 = vlaneseq }
  0x86   : > { %260 = vst.msk [vmem:[#allocation2] sm:$0xff] %vm259_vm0, %v1490_v0  ;;  %v276_v3 = vld [vmem:[#allocation6 + $0x30] sm:$0xff]  ;;  %v1148_v4 = vpack.c.bf16 %v275_v2, %v274_v1  ;;  %v277_v5 = vld [vmem:[#allocation6 + $0x38] sm:$0xff]  ;;  %v267_v9 = vld [vmem:[#allocation6] sm:$0xff]  ;;  %s1045_s21 = sshll.u32 %s1540_s19, 8  ;;  %s257_s23 = scalar_lea.vmem [#allocation11], %s1022_s26 }
  0x87   : > { %v1740_v6 = vld [vmem:[%s221_s9] sm:$0xff]  ;;  %v1742_v7 = vld [vmem:[%s221_s9 + $0x8] sm:$0xff]  ;;  %v1152_v8 = vpack.c.bf16 %v277_v5, %v276_v3  ;;  %v1754_v28 = vshrl.u32 %v530_v27, 7  ;;  %s910_s14 = sshll.u32 %s257_s23, 4  ;;  %s1793_s8 = scalar_lea.hbm %s1846_s4, %s1045_s21  ;;  %s1795_s14 = int_to_ptr.vmem [resolvable:$true] %s910_s14 }
  0x88   : > { %263 = vst.msk [vmem:[#allocation2 + $0x8] sm:$0xff] %vm259_vm0, %v1740_v6  ;;  %264 = vst.msk [vmem:[#allocation2 + $0x10] sm:$0xff] %vm259_vm0, %v1742_v7  ;;  %v268_v10 = vld [vmem:[#allocation6 + $0x8] sm:$0xff]  ;;  %1149 = vmatprep.subr.bf16.mxu0 %v1148_v4  ;;  %v269_v12 = vld [vmem:[#allocation6 + $0x10] sm:$0xff]  ;;  %s897_s19 = scalar_lea.sflag [#allocation5], %s1721_s11  ;;  %s1408_s28 = scalar_lea.vmem %s1795_s14, 256 }
  0x89   : > { %1151 = vmatpush3.bf16.msra.mxu0 %v1148_v4  ;;  %v1156_v11 = vpack.c.bf16 %v268_v10, %v267_v9  ;;  %v270_v13 = vld [vmem:[#allocation6 + $0x18] sm:$0xff]  ;;  %v443_v18 = vld [vmem:[#allocation6 + $0x40] sm:$0xff]  ;;  %v444_v19 = vld [vmem:[#allocation6 + $0x48] sm:$0xff]  ;;  %v532_v29 = vsub.s32 0, %v1754_v28  ;;  %v565_v63 = vsub.s32 1, %v1754_v28  ;;  %v571_v0 = vsub.s32 2, %v1754_v28  ;;  %p1409_p10 = scmp.ne.s32.totalorder %s1795_s14, %s1408_s28 }
  0x8a   : > { %1153 = vmatprep.subr.bf16.mxu0 %v1152_v8  ;;  %v1160_v16 = vpack.c.bf16 %v270_v13, %v269_v12  ;;  %v1164_v20 = vpack.c.bf16 %v444_v19, %v443_v18  ;;  %v445_v21 = vld [vmem:[#allocation6 + $0x50] sm:$0xff]  ;;  %v446_v22 = vld [vmem:[#allocation6 + $0x58] sm:$0xff]  ;;  %v1757_v30 = vld [vmem:[#allocation9] sm:$0xff]  ;;  %s1491_s30 = smov [#allocation11]  }
  0x8b   : > { %v1168_v24 = vpack.c.bf16 %v446_v22, %v445_v21  ;;  %v533_v31 = vrot.slane %v1757_v30, %v532_v29  ;;  %v588_v48 = vld [vmem:[#allocation8 + $0x20] sm:$0xff]  ;;  %v589_v49 = vld [vmem:[#allocation8 + $0x28] sm:$0xff]  ;;  %v590_v51 = vld [vmem:[#allocation8 + $0x30] sm:$0xff]  ;;  %v566_v1 = vrot.slane %v1757_v30, %v565_v63  ;;  %v572_v3 = vrot.slane %v1757_v30, %v571_v0  ;;  %p1410_p3 = pnand %p1409_p10, %p1670_p5  ;;  %s1412_s29 = sshll.u32 %s1491_s30, 4  ;;  %s1413_s29 = int_to_ptr.vmem [resolvable:$false] %s1412_s29 }
  0x8c   : > { %v1172_v50 = vpack.c.bf16 %v589_v49, %v588_v48  ;;  %v591_v52 = vld [vmem:[#allocation8 + $0x38] sm:$0xff]  ;;  %v581_v54 = vld [vmem:[#allocation8] sm:$0xff]  ;;  %v582_v55 = vld [vmem:[#allocation8 + $0x8] sm:$0xff]  ;;  %s1414_s24 = scalar_lea.vmem %s1413_s29, 512  ;;  %p1415_p12 = scmp.lt.s32.totalorder %s1795_s14, %s1413_s29 }
  0x8d   : > { %1155 = vmatpush3.bf16.msra.mxu0 %v1152_v8  ;;  %v1176_v53 = vpack.c.bf16 %v591_v52, %v590_v51  ;;  %v1180_v56 = vpack.c.bf16 %v582_v55, %v581_v54  ;;  %v579_v19 = vld [vmem:[#allocation2] sm:$0xff]  ;;  %v757_v21 = vld [vmem:[#allocation8 + $0x40] sm:$0xff]  ;;  %v878_v55 = vsub.s32 4, %v1754_v28  ;;  %p1411_p7 = pneg %p1410_p3  ;;  %p1416_p1 = scmp.lt.s32.totalorder %s1414_s24, %s1408_s28 }
  0x8e   : > { %1157 = vmatprep.subr.bf16.mxu0 %v1156_v11  ;;  %1173 = vmatprep.subr.bf16.mxu1 %v1172_v50  ;;  %v758_v22 = vld [vmem:[#allocation8 + $0x48] sm:$0xff] }
  0x8f   : > { %v271_v14 = vld [vmem:[#allocation2 + $0x6] sm:$0xff]  ;;  %v272_v15 = vld [vmem:[#allocation2 + $0xe] sm:$0xff]  ;;  %1175 = vmatpush3.bf16.msra.mxu1 %v1172_v50  ;;  %p1417_p2 = por %p1416_p1, %p1415_p12 }
  0x90   : > { %v265_v17 = vld [vmem:[#allocation2 + $0x4] sm:$0xff]  ;;  %1090 = vmatprep.mubr.msk.f32.mxu0 %vm259_vm0, %v271_v14  ;;  %v266_v23 = vld [vmem:[#allocation2 + $0xc] sm:$0xff]  ;;  %1177 = vmatprep.subr.bf16.mxu1 %v1176_v53 }
  0x91   : > { %1091 = vmatmul.mubr.msk.f32.vlgmr.msra.gmra.mrb[0].mxu0 %vm259_vm0, %v272_v15  ;;  %v440_v25 = vld [vmem:[#allocation2 + $0x8] sm:$0xff]  ;;  %v441_v26 = vld [vmem:[#allocation2 + $0x10] sm:$0xff]  ;;  %p1418_p4 = pnand %p1417_p2, %p1411_p7 }
  0x92   : > { %1159 = vmatpush3.bf16.msra.mxu0 %v1156_v11  ;;  %1101 = vmatprep.mubr.msk.f32.mxu0 %vm259_vm0, %v265_v17  ;;  %v584_v17 = vld [vmem:[#allocation8 + $0x18] sm:$0xff] }
  0x93   : > { %1161 = vmatprep.subr.bf16.mxu0 %v1160_v16  ;;  %1179 = vmatpush3.bf16.msra.mxu1 %v1176_v53 }
  0x94   : > { %1181 = vmatprep.subr.bf16.mxu1 %v1180_v56 }
  0x96   : > { %1163 = vmatpush3.bf16.msra.mxu0 %v1160_v16  ;;  %v583_v16 = vld [vmem:[#allocation8 + $0x10] sm:$0xff] }
  0x97   : > { %1165 = vmatprep.subr.bf16.mxu0 %v1164_v20  ;;  %v1184_v18 = vpack.c.bf16 %v584_v17, %v583_v16 }
  0x99   : > { %1102 = vmatmul.mubr.msk.f32.vlgmr.msra.gmra.mrb[0].mxu0 %vm259_vm0, %v266_v23  ;;  %v1188_v23 = vpack.c.bf16 %v758_v22, %v757_v21 }
  0x9a   : > { %1167 = vmatpush3.bf16.msra.mxu0 %v1164_v20  ;;  %1112 = vmatprep.mubr.msk.f32.mxu0 %vm259_vm0, %v440_v25  ;;  %v760_v25 = vld [vmem:[#allocation8 + $0x58] sm:$0xff] }
  0x9b   : > { %1169 = vmatprep.subr.bf16.mxu0 %v1168_v24 }
  0x9e   : > { %1171 = vmatpush3.bf16.msra.mxu0 %v1168_v24  ;;  %v759_v24 = vld [vmem:[#allocation8 + $0x50] sm:$0xff] }
  0xa1   : > { %1113 = vmatmul.mubr.msk.f32.vlgmr.msra.gmra.mrb[0].mxu0 %vm259_vm0, %v441_v26  ;;  %v1192_v26 = vpack.c.bf16 %v760_v25, %v759_v24 }
 0x174   : > { %v1114_v32 = vpop.f32.mrb[0].mxu0 }
 0x175   : > { %v519_v33 = vpop.f32.mrb[1].mxu0  ;;  %v535_v35 = vadd.f32 %v1114_v32, %v533_v31 }
 0x176   : > { %v534_v34 = vadd.f32 %v533_v31, %v519_v33  ;;  %v846_v31 = vsub.s32 3, %v1754_v28 }
 0x177   : > { %v539_v37 = vsel %vm259_vm0, %v535_v35, 0.0 }
 0x178   : > { %v536_v36 = vsel %vm259_vm0, %v534_v34, 0.0  ;;  %v847_v32 = vrot.slane %v1757_v30, %v846_v31 }
 0x179   : > { %537 = vadd.xlane.f32.xlu0 %v536_v36 }
 0x17d   : > { %540 = vadd.xlane.f32.xlu0 %v539_v37 }
 0x206   : > { %v538_v38 = vpop.xlane.xlu0 %537 }
 0x207   : > { %v543_v39 = vmul.f32 0.03125, %v538_v38 }
 0x209   : > { %v545_v40 = vsub.f32 %v534_v34, %v543_v39 }
 0x20a   : > { %v541_v41 = vpop.xlane.xlu0 %540 }
 0x20b   : > { %v544_v42 = vmul.f32 0.03125, %v541_v41  ;;  %v547_v43 = vmul.f32 %v545_v40, %v545_v40 }
 0x20d   : > { %v546_v44 = vsub.f32 %v535_v35, %v544_v42  ;;  %v549_v45 = vsel %vm259_vm0, %v547_v43, 0.0 }
 0x20e   : > { %550 = vadd.xlane.f32.xlu1 %v549_v45 }
 0x20f   : > { %v548_v46 = vmul.f32 %v546_v44, %v546_v44 }
 0x211   : > { %v552_v47 = vsel %vm259_vm0, %v548_v46, 0.0 }
 0x212   : > { %553 = vadd.xlane.f32.xlu1 %v552_v47 }
 0x29b   : > { %v551_v57 = vpop.xlane.xlu1 %550 }
 0x29c   : > { %v555_v58 = vmul.f32 0.03125, %v551_v57  ;;  %v879_v57 = vrot.slane %v1757_v30, %v878_v55 }
 0x29e   : > { %v557_v59 = vadd.f32 1e-08, %v555_v58 }
 0x29f   : > { %v554_v60 = vpop.xlane.xlu1 %553 }
 0x2a0   : > { %1286 = vrsqrt.f32 %v557_v59  ;;  %v556_v61 = vmul.f32 0.03125, %v554_v60 }
 0x2a2   : > { %v558_v62 = vadd.f32 1e-08, %v556_v61 }
 0x2a4   : > { %1288 = vrsqrt.f32 %v558_v62 }
 0x2aa   : > { %v1287_v2 = vpop.eup %1286 }
 0x2ab   : > { %v561_v4 = vmul.f32 %v1287_v2, %v545_v40 }
 0x2ad   : > { %v567_v5 = vmul.f32 %v566_v1, %v561_v4 }
 0x2ae   : > { %v1289_v8 = vpop.eup %1288 }
 0x2af   : > { %v573_v9 = vadd.f32 %v572_v3, %v567_v5  ;;  %v562_v10 = vmul.f32 %v1289_v8, %v546_v44 }
 0x2b1   : > { %v575_v11 = vmax.f32 %v573_v9, 0.0  ;;  %v568_v12 = vmul.f32 %v566_v1, %v562_v10 }
 0x2b3   : > { %577 = vst.msk [vmem:[#allocation2 + $0x8] sm:$0xff] %vm259_vm0, %v575_v11  ;;  %v574_v13 = vadd.f32 %v572_v3, %v568_v12 }
 0x2b5   : > { %v576_v14 = vmax.f32 %v574_v13, 0.0 }
 0x2b7   : > { %578 = vst.msk [vmem:[#allocation2 + $0x10] sm:$0xff] %vm259_vm0, %v576_v14 }
 0x2ba   : > { %v585_v15 = vld [vmem:[#allocation2 + $0x4] sm:$0xff] }
 0x2bb   : > { %1123 = vmatprep.mubr.msk.f32.mxu1 %vm259_vm0, %v585_v15  ;;  %v580_v27 = vld [vmem:[#allocation2 + $0x8] sm:$0xff] }
 0x2be   : > { %v586_v20 = vld [vmem:[#allocation2 + $0xc] sm:$0xff] }
 0x2bf   : > { %1124 = vmatmul.mubr.msk.f32.vlgmr.msra.gmra.mrb[0].mxu1 %vm259_vm0, %v586_v20  ;;  %v755_v29 = vld [vmem:[#allocation2 + $0x10] sm:$0xff] }
 0x2c0   : > { %1183 = vmatpush3.bf16.msra.mxu1 %v1180_v56  ;;  %1134 = vmatprep.mubr.msk.f32.mxu1 %vm259_vm0, %v579_v19  ;;  %v884_v56 = vsub.s32 5, %v1754_v28 }
 0x2c1   : > { %1185 = vmatprep.subr.bf16.mxu1 %v1184_v18 }
 0x2c2   : > { %v885_v60 = vrot.slane %v1757_v30, %v884_v56 }
 0x2c4   : > { %1187 = vmatpush3.bf16.msra.mxu1 %v1184_v18 }
 0x2c5   : > { %1189 = vmatprep.subr.bf16.mxu1 %v1188_v23 }
 0x2c7   : > { %1135 = vmatmul.mubr.msk.f32.vlgmr.msra.gmra.mrb[0].mxu1 %vm259_vm0, %v580_v27 }
 0x2c8   : > { %1191 = vmatpush3.bf16.msra.mxu1 %v1188_v23  ;;  %1145 = vmatprep.mubr.msk.f32.mxu1 %vm259_vm0, %v580_v27 }
 0x2c9   : > { %1193 = vmatprep.subr.bf16.mxu1 %v1192_v26 }
 0x2cc   : > { %1195 = vmatpush3.bf16.msra.mxu1 %v1192_v26 }
 0x2cf   : > { %1146 = vmatmul.mubr.msk.f32.vlgmr.msra.gmra.mrb[0].mxu1 %vm259_vm0, %v755_v29 }
 0x3a2   : > { %v1147_v33 = vpop.f32.mrb[0].mxu1 }
 0x3a3   : > { %v849_v34 = vadd.f32 %v1147_v33, %v847_v32  ;;  %v833_v35 = vpop.f32.mrb[1].mxu1 }
 0x3a4   : > { %v848_v36 = vadd.f32 %v847_v32, %v833_v35 }
 0x3a5   : > { %v853_v37 = vsel %vm259_vm0, %v849_v34, 0.0 }
 0x3a6   : > { %854 = vadd.xlane.f32.xlu1 %v853_v37  ;;  %v850_v38 = vsel %vm259_vm0, %v848_v36, 0.0 }
 0x3a7   : > { %851 = vadd.xlane.f32.xlu0 %v850_v38 }
 0x433   : > { %v855_v39 = vpop.xlane.xlu1 %854 }
 0x434   : > { %v857_v40 = vmul.f32 0.03125, %v855_v39  ;;  %v852_v41 = vpop.xlane.xlu0 %851 }
 0x435   : > { %v856_v42 = vmul.f32 0.03125, %v852_v41 }
 0x436   : > { %v859_v43 = vsub.f32 %v849_v34, %v857_v40 }
 0x437   : > { %v858_v44 = vsub.f32 %v848_v36, %v856_v42 }
 0x438   : > { %v861_v45 = vmul.f32 %v859_v43, %v859_v43 }
 0x439   : > { %v860_v46 = vmul.f32 %v858_v44, %v858_v44 }
 0x43a   : > { %v865_v47 = vsel %vm259_vm0, %v861_v45, 0.0 }
 0x43b   : > { %866 = vadd.xlane.f32.xlu1 %v865_v47  ;;  %v862_v48 = vsel %vm259_vm0, %v860_v46, 0.0 }
 0x43c   : > { %863 = vadd.xlane.f32.xlu0 %v862_v48 }
 0x4c8   : > { %v867_v49 = vpop.xlane.xlu1 %866 }
 0x4c9   : > { %v869_v50 = vmul.f32 0.03125, %v867_v49  ;;  %v864_v51 = vpop.xlane.xlu0 %863 }
 0x4ca   : > { %v868_v52 = vmul.f32 0.03125, %v864_v51 }
 0x4cb   : > { %v871_v53 = vadd.f32 1e-08, %v869_v50 }
 0x4cc   : > { %v870_v54 = vadd.f32 1e-08, %v868_v52 }
 0x4cd   : > { %1290 = vrsqrt.f32 %v871_v53 }
 0x4ce   : > { %1292 = vrsqrt.f32 %v870_v54 }
 0x4d7   : > { %v1291_v58 = vpop.eup %1290 }
 0x4d8   : > { %v1293_v59 = vpop.eup %1292  ;;  %v875_v61 = vmul.f32 %v1291_v58, %v859_v43 }
 0x4d9   : > { %v874_v62 = vmul.f32 %v1293_v59, %v858_v44 }
 0x4da   : > { %v881_v63 = vmul.f32 %v879_v57, %v875_v61 }
 0x4db   : > { %v880_v0 = vmul.f32 %v879_v57, %v874_v62 }
 0x4dc   : > { %v887_v1 = vadd.f32 %v885_v60, %v881_v63 }
 0x4dd   : > { %v886_v2 = vadd.f32 %v885_v60, %v880_v0 }
 0x4de   : > { %v889_v3 = vmax.f32 %v887_v1, 0.0 }
 0x4df   : > { %v888_v28 = vmax.f32 %v886_v2, 0.0 }
 0x4e0   : > { %v893_v4 = vadd.f32 %v889_v3, %v1742_v7 }
 0x4e1   : > { %v892_v30 = vadd.f32 %v888_v28, %v1740_v6 }
 0x4e2   : > { %895 = vst.msk [vmem:[%s257_s23 + $0x8] sm:$0xff] %vm259_vm0, %v893_v4 }
 0x4e3   : > { %894 = vst.msk [vmem:[%s257_s23] sm:$0xff] %vm259_vm0, %v892_v30 }
 0x4e4   : > { %1421 = shalt.err (!%p1418_p4)
}
 0x4e5   : > { %s1422_s5 = scalar_lea.hbm %s1793_s8, 256  ;;  %s1426_s26 = scalar_lea.hbm %s1846_s4, 512 }
 0x4e6   : > { %p1423_p9 = scmp.ne.s32.totalorder %s1793_s8, %s1422_s5  ;;  %p1427_p8 = scmp.lt.u32.totalorder %s1793_s8, %s1846_s4 }
 0x4e7   : > { %p1428_p13 = scmp.lt.u32.totalorder %s1426_s26, %s1422_s5  ;;  %p1430_p10 = scmp.lt.u32.totalorder %s1422_s5, %s1793_s8 }
 0x4e8   : > { %p1424_p0 = pnand %p1423_p9, %p1670_p5 }
 0x4e9   : > { %p1429_p6 = por %p1428_p13, %p1427_p8 }
 0x4ea   : > { %p1425_p11 = pneg %p1424_p0 }
 0x4eb   : > { %p1431_p3 = por %p1430_p10, %p1429_p6 }
 0x4ed   : > { %p1432_p7 = pnand %p1431_p3, %p1425_p11 }
 0x4ef   : > { %1435 = shalt.err (!%p1432_p7)
}
 0x4f0   : > { %s1492_s21 = smov 128   ;;  %s1493_s23 = smov 8  }
 0x4f1   : > { %1218 = dma.vmem_to_hbm [thread:$0]  (%p1670_p5), %s1795_s14, 256, %s1793_s8, %s897_s19, %s1492_s21, %s1492_s21, %s1493_s23  }
 0x4f2 PF: > { %s925_s20 = sand.u32 1, %s1470_s15   ;;  %p1864_p12 = scmp.ne.s32.totalorder %s1851_s22, 0 }
 0x4f3   : > { %p1865_p1 = scmp.ge.s32.totalorder %s1482_s18, 2  ;;  %s926_s6 = scalar_lea.sflag [#allocation5], %s925_s20 }
 0x4f5   : > { %p1235_p2 = pnand %p1865_p1, %p1864_p12 }
 0x4f7   : > { %1465 = dma.done.wait (!%p1235_p2), %s926_s6, 256  }
 0x4f8   : > { %1467 = vsyncadd (!%p1235_p2), %s926_s6, 4294967040  ;;  %p19_p4 = scmp.ge.s32.totalorder %s1656_s10, 4   ;;  %s1866_s15 = smov %s1474_s16 }
 0x4f9   : > { %s1867_s16 = smov %s1478_s17  ;;  %s1868_s17 = smov %s1666_s12 }
 0x4fa   : > { %s1869_s18 = smov %s1656_s10  ;;  %21 = sbr.rel (!%p19_p4) target bundleno = 7 (0x7), region = 97 }
 0x501   :  { %931 = vsyncpa [#allocation4], 1 }
 0x502   :  { %933 = vsyncpa [#allocation4 + $0x1], 1 }
 0x503   :  { %934 = vsyncpa [#allocation7], 1 }
 0x504   :  { %935 = vsyncpa [#allocation10], 1 }
 0x505   :  { %936 = vsyncpa [#allocation5], 1 }
 0x506   :  { %938 = vsyncpa [#allocation5 + $0x1], 1 }

</bundles_post_ra>
